<compile_context>
chip_gen: v5e
topology: v5e:2x2
jax: 0.10.0
libtpu: 0.0.40
codegen_flags: <defaults>
</compile_context>

<pallas_src>
import math

import jax
import jax.numpy as jnp
import numpy as np
from jax.experimental import pallas as pl
from jax.experimental.pallas import tpu as pltpu

_VMEM_LIMIT_BYTES = 48 * 1024 * 1024   # explicit scoped-VMEM limit (< v7x 64 MiB/TC)
_VMEM_TILE_BUDGET = 40 * 1024 * 1024   # target working set used for tile selection


def _vpl_kernel(x_ref, w_ref, bias_ref, o_ref):
    # x_ref   : (tm, K)  m_per images x (1+P) rows; row 0 of each image is zeros
    # w_ref   : (K, D)   conv1 weight as matmul operand (resident, single-buffered)
    # bias_ref: (tm, D)  [class_emb+pos[0]; pos[1:]] tiled m_per times, model dtype
    # o_ref   : (tm, D)  final token rows for these m_per images (lane-dense store)
    acc = jnp.dot(x_ref[...], w_ref[...],
                  preferred_element_type=jnp.float32)          # MXU, f32 accumulation
    o_ref[...] = (acc + bias_ref[...].astype(jnp.float32)).astype(o_ref.dtype)


def vision_prompt_learner_forward(x_nchw, conv1_weight, class_embedding,
                                  positional_embedding, ctx, *,
                                  matmul_dtype=None, target_rows=2048,
                                  vmem_tile_budget=_VMEM_TILE_BUDGET):
    """Forward pass of VisionPromptLearner.

    x_nchw:               (B, C, H, W)        image input (NCHW, like PyTorch)
    conv1_weight:         (D, C, ps, ps)      patch-embed conv weight (no bias)
    class_embedding:      (D,)
    positional_embedding: (1+P, D)
    ctx:                  (layer_p, n_pro, D) vision prompt parameter
    matmul_dtype:         MXU operand dtype.  Default: bf16 when the model dtype is
                          half precision, else the model dtype.  Passing
                          jnp.bfloat16 explicitly is recommended on v6e/v7x for f32
                          models (accumulation is always f32).
    Returns (tokens (B, 1+P, D), ctx_expanded (B, layer_p, n_pro, D)).
    Production CLIP widths (D = 512/768/1024) are 128-multiples -> unmasked stores.
    """
    B, C, H, W = x_nchw.shape
    D, Cw, ps, _ = conv1_weight.shape
    assert C == Cw and H % ps == 0 and W % ps == 0
    gh, gw = H // ps, W // ps
    P = gh * gw
    K = C * ps * ps
    rows = 1 + P                                   # tokens per image (class + patches)
    dtype = conv1_weight.dtype

    if matmul_dtype is None:                       # bf16 MXU when model dtype allows
        matmul_dtype = jnp.bfloat16 if jnp.dtype(dtype).itemsize <= 2 else dtype
    op_dtype = jnp.dtype(matmul_dtype)
    op_bytes = op_dtype.itemsize
    out_bytes = jnp.dtype(dtype).itemsize

    # ---- tile selection: m_per whole images per grid step -----------------------
    mult = 8 // math.gcd(rows, 8)                  # smallest m with (m*rows) % 8 == 0

    def working_set(mp):                           # estimated VMEM bytes for one step
        tm_ = mp * rows
        return (2 * tm_ * K * op_bytes             # x tile   (double-buffered)
                + 2 * tm_ * D * out_bytes          # out tile (double-buffered)
                + K * D * op_bytes                 # weight   (resident, Buffered(1))
                + tm_ * D * out_bytes)             # bias     (resident, Buffered(1))

    m_per = max(mult, (max(target_rows, rows) // rows) // mult * mult)
    m_per = min(m_per, -(-B // mult) * mult)       # no more images/tile than needed
    if B >= 2 * mult:                              # keep >=2 grid tiles (v7x: 2 TCs)
        m_per = min(m_per, max(mult, (B // (2 * mult)) * mult))
    while m_per > mult and working_set(m_per) > vmem_tile_budget:
        m_per -= mult
    n_tiles = -(-B // m_per)
    B_pad = n_tiles * m_per
    tm = m_per * rows
    M_pad = B_pad * rows
    vmem_limit = max(_VMEM_LIMIT_BYTES, working_set(m_per) + (8 << 20))

    # ---- glue: patchify x in ONE fused HBM pass ----------------------------------
    # astype + 6-D transpose + single pad (batch pad AND leading class-token zero row)
    # fuse into one XLA copy; the reshapes are free.  K is left un-padded: the block
    # uses the full-extent last dim and Mosaic pads lanes internally.
    # TODO(synk): feed NHWC activations upstream so this transpose becomes a free reshape.
    xp = x_nchw.astype(op_dtype).reshape(B, C, gh, ps, gw, ps)
    xp = xp.transpose(0, 2, 4, 1, 3, 5).reshape(B, P, K)          # (B, P, K)
    xp = jnp.pad(xp, ((0, B_pad - B), (1, 0), (0, 0)))            # (B_pad, 1+P, K)
    x_flat = xp.reshape(M_pad, K)

    # ---- batch-invariant operands (prepared/cast once) ---------------------------
    w2d = conv1_weight.reshape(D, K).T.astype(op_dtype)           # (K, D)
    pos = positional_embedding.astype(dtype)                      # (1+P, D)
    cls_row = (class_embedding.astype(jnp.float32)
               + positional_embedding[0].astype(jnp.float32)).astype(dtype)
    bias_one = jnp.concatenate([cls_row[None, :], pos[1:]], axis=0)   # (1+P, D)
    bias_tile = jnp.tile(bias_one, (m_per, 1))                        # (tm, D), model dtype

    x_spec = pl.BlockSpec((tm, K), lambda i: (i, 0))
    out_spec = pl.BlockSpec((tm, D), lambda i: (i, 0))
    cost = pl.CostEstimate(
        flops=2 * M_pad * K * D,
        bytes_accessed=(M_pad * K + K * D) * op_bytes + (tm * D + M_pad * D) * out_bytes,
        transcendentals=0)

    def run(single_buffer_invariants):
        if single_buffer_invariants:
            # constant index_map -> fetched once; 1 buffer instead of 2 saves VMEM
            w_spec = pl.BlockSpec((K, D), lambda i: (0, 0), pipeline_mode=pl.Buffered(1))
            b_spec = pl.BlockSpec((tm, D), lambda i: (0, 0), pipeline_mode=pl.Buffered(1))
        else:
            w_spec = pl.BlockSpec((K, D), lambda i: (0, 0))
            b_spec = pl.BlockSpec((tm, D), lambda i: (0, 0))
        return pl.pallas_call(
            _vpl_kernel,
            out_shape=jax.ShapeDtypeStruct((M_pad, D), dtype),
            grid_spec=pltpu.PrefetchScalarGridSpec(
                num_scalar_prefetch=0,
                grid=(n_tiles,),
                in_specs=[x_spec, w_spec, b_spec],
                out_specs=out_spec),
            compiler_params=pltpu.CompilerParams(
                dimension_semantics=("parallel",),
                vmem_limit_bytes=vmem_limit),
            cost_estimate=cost,
        )(x_flat, w2d, bias_tile)

    try:
        tok_flat = run(True)
    except Exception:
        # pl.Buffered(1) not supported by this jax build -> default double buffering.
        tok_flat = run(False)

    # reshape is free (row-major); the [:B] slice only copies when B_pad > B
    tokens = tok_flat.reshape(B_pad, rows, D)[:B]                  # (B, 1+P, D)

    # ---- glue: ctx.unsqueeze(0).expand(B, ...) (no compute) ----------------------
    lp, n_pro, ctx_dim = ctx.shape
    ctx_expanded = jnp.broadcast_to(ctx[None], (B, lp, n_pro, ctx_dim))
    return tokens, ctx_expanded


def _reference(x, conv1_weight, class_embedding, positional_embedding, ps):
    """Pure-JAX reference (same math via lax.conv) to validate semantics."""
    B = x.shape[0]
    D = conv1_weight.shape[0]
    conv = jax.lax.conv_general_dilated(
        x, conv1_weight, window_strides=(ps, ps), padding="VALID",
        dimension_numbers=("NCHW", "OIHW", "NCHW"),
        precision=jax.lax.Precision.HIGHEST)                      # (B, D, gh, gw)
    body = conv.reshape(B, D, -1).transpose(0, 2, 1)              # (B, P, D)
    cls = jnp.broadcast_to(class_embedding[None, None, :], (B, 1, D))
    return jnp.concatenate([cls, body], axis=1) + positional_embedding[None]


if __name__ == "__main__":
    # Small shapes consistent with the module: B=2, C=3, H=W=16, patch 4 -> P=16
    # patches, visual width D=32 (= ctx_dim), layer_p=2, n_pro=4.
    # (Production CLIP: P=196, K=D=768 -> D is a 128-multiple so stores are unmasked;
    #  D=32 here is a demo artifact and only costs masked lane stores.)
    B, C, H, W = 2, 3, 16, 16
    ps, D = 4, 32
    layer_p, n_pro = 2, 4
    P = (H // ps) * (W // ps)
    dtype = jnp.float32                      # stand-in for clip_model.dtype

    key = jax.random.PRNGKey(0)
    k_x, k_w, k_cls, k_pos, k_ctx, k_x2 = jax.random.split(key, 6)

    x = jax.random.normal(k_x, (B, C, H, W), dtype=dtype)
    conv1_weight = jax.random.normal(k_w, (D, C, ps, ps), dtype=dtype) * 0.02
    class_embedding = jax.random.normal(k_cls, (D,), dtype=dtype) * 0.02
    positional_embedding = jax.random.normal(k_pos, (1 + P, D), dtype=dtype) * 0.02
    ctx = jax.random.normal(k_ctx, (layer_p, n_pro, D), dtype=dtype) * 0.02

    # --- run 1: f32 operands, single grid tile ------------------------------------
    tokens, ctx_out = vision_prompt_learner_forward(
        x, conv1_weight, class_embedding, positional_embedding, ctx)
    tokens = jax.block_until_ready(tokens)
    ctx_out = jax.block_until_ready(ctx_out)
    ref = _reference(x, conv1_weight, class_embedding, positional_embedding, ps)
    # tolerance covers either exact-f32 or multi-bf16-pass MXU lowering of the f32 matmul
    np.testing.assert_allclose(np.asarray(tokens), np.asarray(ref), rtol=2e-3, atol=2e-3)
    assert tokens.shape == (B, 1 + P, D) and tokens.dtype == dtype
    assert ctx_out.shape == (B, layer_p, n_pro, D)

    # --- run 2: bf16 MXU operands (recommended on v6e/v7x) + multi-tile grid -------
    B2 = 20                                   # forces n_tiles > 1 and a padded last tile
    x2 = jax.random.normal(k_x2, (B2, C, H, W), dtype=dtype)
    tokens2, _ = vision_prompt_learner_forward(
        x2, conv1_weight, class_embedding, positional_embedding, ctx,
        matmul_dtype=jnp.bfloat16)
    tokens2 = jax.block_until_ready(tokens2)
    ref2 = _reference(x2, conv1_weight, class_embedding, positional_embedding, ps)
    np.testing.assert_allclose(np.asarray(tokens2), np.asarray(ref2), rtol=2e-2, atol=2e-2)
    assert tokens2.shape == (B2, 1 + P, D)

    print("KERNEL_OK")
</pallas_src>

<mosaic_0001>
module attributes {stable_mosaic.version = 11 : i64} {
  func.func @_vpl_kernel(%arg0: i32, %arg1: memref<136x48xf32, #tpu.memory_space<vmem>>, %arg2: memref<48x32xf32, #tpu.memory_space<vmem>>, %arg3: memref<136x32xf32, #tpu.memory_space<vmem>>, %arg4: memref<136x32xf32, #tpu.memory_space<vmem>>) attributes {dimension_semantics = [#tpu.dimension_semantics<parallel>], iteration_bounds = array<i64: 1>, scalar_prefetch = 0 : i64, scratch_operands = 0 : i64, tpu.core_type = #tpu.core_type<tc>, window_params = [{transform_indices = @transform_0, window_bounds = array<i64: 136, 48>}, {pipeline_mode = #tpu.pipeline_mode<synchronous>, transform_indices = @transform_1, window_bounds = array<i64: 48, 32>}, {pipeline_mode = #tpu.pipeline_mode<synchronous>, transform_indices = @transform_2, window_bounds = array<i64: 136, 32>}, {transform_indices = @transform_3, window_bounds = array<i64: 136, 32>}]} {
    %c0 = arith.constant 0 : index
    %c0_0 = arith.constant 0 : index
    %0 = vector.load %arg1[%c0, %c0_0] : memref<136x48xf32, #tpu.memory_space<vmem>>, vector<136x48xf32>
    %c0_1 = arith.constant 0 : index
    %c0_2 = arith.constant 0 : index
    %1 = vector.load %arg2[%c0_1, %c0_2] : memref<48x32xf32, #tpu.memory_space<vmem>>, vector<48x32xf32>
    %cst = arith.constant dense<0.000000e+00> : vector<136x32xf32>
    %2 = tpu.matmul %0, %1, %cst {dimension_numbers = #tpu.dot_dimension_numbers<[1], [0], [0], [1], [0, 0, 1, 1], [], []>} : vector<136x48xf32>, vector<48x32xf32>, vector<136x32xf32> -> vector<136x32xf32>
    %c0_3 = arith.constant 0 : index
    %c0_4 = arith.constant 0 : index
    %3 = vector.load %arg3[%c0_3, %c0_4] : memref<136x32xf32, #tpu.memory_space<vmem>>, vector<136x32xf32>
    %4 = arith.addf %2, %3 : vector<136x32xf32>
    %c0_5 = arith.constant 0 : index
    %c0_6 = arith.constant 0 : index
    %5 = vector.load %arg4[%c0_5, %c0_6] : memref<136x32xf32, #tpu.memory_space<vmem>>, vector<136x32xf32>
    tpu.vector_store %arg4[%c0_5, %c0_6], %4 {strides = array<i32>} : memref<136x32xf32, #tpu.memory_space<vmem>>, vector<136x32xf32>,
    return
  }
  func.func @transform_0(%arg0: i32) -> (i32, i32) {
    %c0_i32 = arith.constant 0 : i32
    %c0_i32_0 = arith.constant 0 : i32
    return %arg0, %c0_i32 : i32, i32
  }
  func.func @transform_1(%arg0: i32) -> (i32, i32) {
    %c0_i32 = arith.constant 0 : i32
    %c0_i32_0 = arith.constant 0 : i32
    %c0_i32_1 = arith.constant 0 : i32
    return %c0_i32, %c0_i32_0 : i32, i32
  }
  func.func @transform_2(%arg0: i32) -> (i32, i32) {
    %c0_i32 = arith.constant 0 : i32
    %c0_i32_0 = arith.constant 0 : i32
    %c0_i32_1 = arith.constant 0 : i32
    return %c0_i32, %c0_i32_0 : i32, i32
  }
  func.func @transform_3(%arg0: i32) -> (i32, i32) {
    %c0_i32 = arith.constant 0 : i32
    %c0_i32_0 = arith.constant 0 : i32
    return %arg0, %c0_i32 : i32, i32
  }
}

module attributes {stable_mosaic.version = 11 : i64} {
  func.func @_vpl_kernel(%arg0: i32, %arg1: memref<136x48xf32, #tpu.memory_space<vmem>>, %arg2: memref<48x32xf32, #tpu.memory_space<vmem>>, %arg3: memref<136x32xf32, #tpu.memory_space<vmem>>, %arg4: memref<136x32xf32, #tpu.memory_space<vmem>>) attributes {dimension_semantics = [#tpu.dimension_semantics<parallel>], iteration_bounds = array<i64: 1>, scalar_prefetch = 0 : i64, scratch_operands = 0 : i64, tpu.core_type = #tpu.core_type<tc>, window_params = [{transform_indices = @transform_0, window_bounds = array<i64: 136, 48>}, {pipeline_mode = #tpu.pipeline_mode<synchronous>, transform_indices = @transform_1, window_bounds = array<i64: 48, 32>}, {pipeline_mode = #tpu.pipeline_mode<synchronous>, transform_indices = @transform_2, window_bounds = array<i64: 136, 32>}, {transform_indices = @transform_3, window_bounds = array<i64: 136, 32>}]} {
    %c0 = arith.constant 0 : index
    %c0_0 = arith.constant 0 : index
    %0 = vector.load %arg1[%c0, %c0_0] : memref<136x48xf32, #tpu.memory_space<vmem>>, vector<136x48xf32>
    %c0_1 = arith.constant 0 : index
    %c0_2 = arith.constant 0 : index
    %1 = vector.load %arg2[%c0_1, %c0_2] : memref<48x32xf32, #tpu.memory_space<vmem>>, vector<48x32xf32>
    %cst = arith.constant dense<0.000000e+00> : vector<136x32xf32>
    %2 = tpu.matmul %0, %1, %cst {dimension_numbers = #tpu.dot_dimension_numbers<[1], [0], [0], [1], [0, 0, 1, 1], [], []>} : vector<136x48xf32>, vector<48x32xf32>, vector<136x32xf32> -> vector<136x32xf32>
    %c0_3 = arith.constant 0 : index
    %c0_4 = arith.constant 0 : index
    %3 = vector.load %arg3[%c0_3, %c0_4] : memref<136x32xf32, #tpu.memory_space<vmem>>, vector<136x32xf32>
    %4 = arith.addf %2, %3 : vector<136x32xf32>
    %c0_5 = arith.constant 0 : index
    %c0_6 = arith.constant 0 : index
    %5 = vector.load %arg4[%c0_5, %c0_6] : memref<136x32xf32, #tpu.memory_space<vmem>>, vector<136x32xf32>
    tpu.vector_store %arg4[%c0_5, %c0_6], %4 {strides = array<i32>} : memref<136x32xf32, #tpu.memory_space<vmem>>, vector<136x32xf32>,
    return
  }
  func.func @transform_0(%arg0: i32) -> (i32, i32) {
    %c0_i32 = arith.constant 0 : i32
    %c0_i32_0 = arith.constant 0 : i32
    return %arg0, %c0_i32 : i32, i32
  }
  func.func @transform_1(%arg0: i32) -> (i32, i32) {
    %c0_i32 = arith.constant 0 : i32
    %c0_i32_0 = arith.constant 0 : i32
    %c0_i32_1 = arith.constant 0 : i32
    return %c0_i32, %c0_i32_0 : i32, i32
  }
  func.func @transform_2(%arg0: i32) -> (i32, i32) {
    %c0_i32 = arith.constant 0 : i32
    %c0_i32_0 = arith.constant 0 : i32
    %c0_i32_1 = arith.constant 0 : i32
    return %c0_i32, %c0_i32_0 : i32, i32
  }
  func.func @transform_3(%arg0: i32) -> (i32, i32) {
    %c0_i32 = arith.constant 0 : i32
    %c0_i32_0 = arith.constant 0 : i32
    return %arg0, %c0_i32 : i32, i32
  }
}

</mosaic_0001>

<bundles_post_ra>
// kernel: tpu_custom_call.1
= control target key start
LH: loop header
LB: loop body
LE: loop exit
PB: predicated region body
PF: predicated region fallthrough
CT: control target
= control target key end

     0   :  { %vm54_vm0 = vcmask 392192   ;;  %vm174_vm1 = vcmask 261120   ;;  %s456_s1 = inlined_call_operand.vmem [shape: f32[48,32], index: 1, kind: input, shape index: {}]   ;;  %s457_s0 = inlined_call_operand.vmem [shape: f32[136,48], index: 0, kind: input, shape index: {}]   ;;  %s458_s2 = inlined_call_operand.vmem [shape: f32[136,32], index: 2, kind: input, shape index: {}]   ;;  %s459_s3 = inlined_call_operand.vmem [shape: f32[136,32], index: 3, kind: output, shape index: {}]  }
   0x1   :  { %v36_v0 = vld [vmem:[%s456_s1 + $0x28] sm:$0xff]  ;;  %v35_v1 = vld [vmem:[%s456_s1 + $0x20] sm:$0xff]  ;;  %v34_v2 = vld [vmem:[%s456_s1 + $0x18] sm:$0xff] }
   0x2   :  { %214 = vmatpush.msra.mxu2 %v36_v0  ;;  %215 = vmatpush.msra.mxu3 %v36_v0  ;;  %v33_v3 = vld [vmem:[%s456_s1 + $0x10] sm:$0xff]  ;;  %v32_v4 = vld [vmem:[%s456_s1 + $0x8] sm:$0xff]  ;;  %v31_v5 = vld [vmem:[%s456_s1] sm:$0xff] }
   0x3   :  { %116 = vmatpush.msra.mxu0 %v36_v0  ;;  %213 = vmatpush.msra.mxu1 %v36_v0  ;;  %v22_v6 = vld [vmem:[%s457_s0 + $0x40] sm:$0xff]  ;;  %v27_v7 = vld [vmem:[%s457_s0 + $0x68] sm:$0xff]  ;;  %v28_v11 = vld [vmem:[%s457_s0 + $0x70] sm:$0xff] }
   0x4   :  { %217 = vmatpush.msra.mxu2 %v35_v1  ;;  %218 = vmatpush.msra.mxu3 %v35_v1  ;;  %v14_v8 = vld [vmem:[%s457_s0] sm:$0xff]  ;;  %v23_v10 = vld [vmem:[%s457_s0 + $0x48] sm:$0xff]  ;;  %v24_v14 = vld [vmem:[%s457_s0 + $0x50] sm:$0xff] }
   0x5   :  { %117 = vmatpush.msra.mxu0 %v35_v1  ;;  %216 = vmatpush.msra.mxu1 %v35_v1  ;;  %v18_v9 = vld [vmem:[%s457_s0 + $0x20] sm:$0xff]  ;;  %v15_v12 = vld [vmem:[%s457_s0 + $0x8] sm:$0xff]  ;;  %v29_v15 = vld [vmem:[%s457_s0 + $0x78] sm:$0xff] }
   0x6   :  { %220 = vmatpush.msra.mxu2 %v34_v2  ;;  %221 = vmatpush.msra.mxu3 %v34_v2  ;;  %v19_v13 = vld [vmem:[%s457_s0 + $0x28] sm:$0xff]  ;;  %v16_v16 = vld [vmem:[%s457_s0 + $0x10] sm:$0xff]  ;;  %v25_v18 = vld [vmem:[%s457_s0 + $0x58] sm:$0xff] }
   0x7   :  { %118 = vmatpush.msra.mxu0 %v34_v2  ;;  %219 = vmatpush.msra.mxu1 %v34_v2  ;;  %v20_v17 = vld [vmem:[%s457_s0 + $0x30] sm:$0xff]  ;;  %v30_v19 = vld [vmem:[%s457_s0 + $0x80] sm:$0xff]  ;;  %v17_v20 = vld [vmem:[%s457_s0 + $0x18] sm:$0xff] }
   0x8   :  { %223 = vmatpush.msra.mxu2 %v33_v3  ;;  %224 = vmatpush.msra.mxu3 %v33_v3  ;;  %v21_v21 = vld [vmem:[%s457_s0 + $0x38] sm:$0xff]  ;;  %v26_v22 = vld [vmem:[%s457_s0 + $0x60] sm:$0xff]  ;;  %v50_v30 = vld [vmem:[%s458_s2 + $0x68] sm:$0xff] }
   0x9   :  { %119 = vmatpush.msra.mxu0 %v33_v3  ;;  %222 = vmatpush.msra.mxu1 %v33_v3  ;;  %v37_v23 = vld [vmem:[%s458_s2] sm:$0xff]  ;;  %v38_v35 = vld [vmem:[%s458_s2 + $0x8] sm:$0xff]  ;;  %v51_v42 = vld [vmem:[%s458_s2 + $0x70] sm:$0xff] }
   0xa   :  { %226 = vmatpush.msra.mxu2 %v32_v4  ;;  %227 = vmatpush.msra.mxu3 %v32_v4  ;;  %v41_v24 = vld [vmem:[%s458_s2 + $0x20] sm:$0xff]  ;;  %v42_v36 = vld [vmem:[%s458_s2 + $0x28] sm:$0xff]  ;;  %v39_v47 = vld [vmem:[%s458_s2 + $0x10] sm:$0xff] }
   0xb   :  { %120 = vmatpush.msra.mxu0 %v32_v4  ;;  %225 = vmatpush.msra.mxu1 %v32_v4  ;;  %v45_v29 = vld [vmem:[%s458_s2 + $0x40] sm:$0xff]  ;;  %v46_v41 = vld [vmem:[%s458_s2 + $0x48] sm:$0xff]  ;;  %v43_v48 = vld [vmem:[%s458_s2 + $0x30] sm:$0xff] }
   0xc   :  { %229 = vmatpush.msra.mxu2 %v31_v5  ;;  %230 = vmatpush.msra.mxu3 %v31_v5  ;;  %v47_v53 = vld [vmem:[%s458_s2 + $0x50] sm:$0xff]  ;;  %v52_v54 = vld [vmem:[%s458_s2 + $0x78] sm:$0xff]  ;;  %v53_v2 = vld [vmem:[%s458_s2 + $0x80] sm:$0xff] }
   0xd   :  { %204 = vmatmul.msk.f32.vlgmr.msra.gmra.mxu2 %vm54_vm0, %v22_v6  ;;  %209 = vmatmul.msk.f32.vlgmr.msra.gmra.mxu3 %vm54_vm0, %v27_v7  ;;  %v40_v59 = vld [vmem:[%s458_s2 + $0x18] sm:$0xff]  ;;  %v49_v7 = vld [vmem:[%s458_s2 + $0x60] sm:$0xff] }
   0xe   :  { %121 = vmatpush.msra.mxu0 %v31_v5  ;;  %228 = vmatpush.msra.mxu1 %v31_v5  ;;  %v44_v60 = vld [vmem:[%s458_s2 + $0x38] sm:$0xff] }
   0xf   :  { %196 = vmatmul.msk.f32.vlgmr.msra.gmra.mxu0 %vm54_vm0, %v14_v8  ;;  %200 = vmatmul.msk.f32.vlgmr.msra.gmra.mxu1 %vm54_vm0, %v18_v9  ;;  %v48_v1 = vld [vmem:[%s458_s2 + $0x58] sm:$0xff] }
  0x15   :  { %205 = vmatmul.msk.f32.gmra.mxu2 %vm54_vm0, %v23_v10  ;;  %210 = vmatmul.msk.f32.gmra.mxu3 %vm54_vm0, %v28_v11 }
  0x17   :  { %197 = vmatmul.msk.f32.gmra.mxu0 %vm54_vm0, %v15_v12  ;;  %201 = vmatmul.msk.f32.gmra.mxu1 %vm54_vm0, %v19_v13 }
  0x1d   :  { %206 = vmatmul.msk.f32.gmra.mxu2 %vm54_vm0, %v24_v14  ;;  %211 = vmatmul.msk.f32.gmra.mxu3 %vm54_vm0, %v29_v15 }
  0x1f   :  { %198 = vmatmul.msk.f32.gmra.mxu0 %vm54_vm0, %v16_v16  ;;  %202 = vmatmul.msk.f32.gmra.mxu1 %vm54_vm0, %v20_v17 }
  0x25   :  { %207 = vmatmul.msk.f32.gmra.mxu2 %vm54_vm0, %v25_v18  ;;  %212 = vmatmul.msk.f32.gmra.mxu3 %vm54_vm0, %v30_v19 }
  0x27   :  { %199 = vmatmul.msk.f32.gmra.mxu0 %vm54_vm0, %v17_v20  ;;  %203 = vmatmul.msk.f32.gmra.mxu1 %vm54_vm0, %v21_v21 }
  0x2d   :  { %208 = vmatmul.msk.f32.gmra.mxu2 %vm54_vm0, %v26_v22 }
  0x8c   :  { %v123_v25 = vpop.f32.mrf.mxu0  ;;  %v135_v26 = vpop.f32.mrf.mxu1 }
  0x8d   :  { %v124_v27 = vadd.f32 %v123_v25, %v37_v23  ;;  %v136_v28 = vadd.f32 %v135_v26, %v41_v24 }
  0x8f   :  { %175 = vst.msk [vmem:[%s459_s3] sm:$0xff] %vm174_vm1, %v124_v27 }
  0x90   :  { %v147_v31 = vpop.f32.mrf.mxu2  ;;  %179 = vst.msk [vmem:[%s459_s3 + $0x20] sm:$0xff] %vm174_vm1, %v136_v28  ;;  %v162_v32 = vpop.f32.mrf.mxu3 }
  0x91   :  { %v148_v33 = vadd.f32 %v147_v31, %v45_v29  ;;  %v163_v34 = vadd.f32 %v162_v32, %v50_v30 }
  0x93   :  { %183 = vst.msk [vmem:[%s459_s3 + $0x40] sm:$0xff] %vm174_vm1, %v148_v33 }
  0x94   :  { %188 = vst.msk [vmem:[%s459_s3 + $0x68] sm:$0xff] %vm174_vm1, %v163_v34  ;;  %v126_v37 = vpop.f32.mrf.mxu0  ;;  %v138_v38 = vpop.f32.mrf.mxu1 }
  0x95   :  { %v127_v39 = vadd.f32 %v126_v37, %v38_v35  ;;  %v139_v40 = vadd.f32 %v138_v38, %v42_v36 }
  0x97   :  { %176 = vst.msk [vmem:[%s459_s3 + $0x8] sm:$0xff] %vm174_vm1, %v127_v39 }
  0x98   :  { %v150_v43 = vpop.f32.mrf.mxu2  ;;  %180 = vst.msk [vmem:[%s459_s3 + $0x28] sm:$0xff] %vm174_vm1, %v139_v40  ;;  %v165_v44 = vpop.f32.mrf.mxu3 }
  0x99   :  { %v151_v45 = vadd.f32 %v150_v43, %v46_v41  ;;  %v166_v46 = vadd.f32 %v165_v44, %v51_v42 }
  0x9b   :  { %184 = vst.msk [vmem:[%s459_s3 + $0x48] sm:$0xff] %vm174_vm1, %v151_v45 }
  0x9c   :  { %189 = vst.msk [vmem:[%s459_s3 + $0x70] sm:$0xff] %vm174_vm1, %v166_v46  ;;  %v129_v49 = vpop.f32.mrf.mxu0  ;;  %v141_v50 = vpop.f32.mrf.mxu1 }
  0x9d   :  { %v130_v51 = vadd.f32 %v129_v49, %v39_v47  ;;  %v142_v52 = vadd.f32 %v141_v50, %v43_v48 }
  0x9f   :  { %177 = vst.msk [vmem:[%s459_s3 + $0x10] sm:$0xff] %vm174_vm1, %v130_v51 }
  0xa0   :  { %v153_v55 = vpop.f32.mrf.mxu2  ;;  %181 = vst.msk [vmem:[%s459_s3 + $0x30] sm:$0xff] %vm174_vm1, %v142_v52  ;;  %v168_v56 = vpop.f32.mrf.mxu3 }
  0xa1   :  { %v154_v57 = vadd.f32 %v153_v55, %v47_v53  ;;  %v169_v58 = vadd.f32 %v168_v56, %v52_v54 }
  0xa3   :  { %185 = vst.msk [vmem:[%s459_s3 + $0x50] sm:$0xff] %vm174_vm1, %v154_v57 }
  0xa4   :  { %190 = vst.msk [vmem:[%s459_s3 + $0x78] sm:$0xff] %vm174_vm1, %v169_v58  ;;  %v132_v61 = vpop.f32.mrf.mxu0  ;;  %v144_v62 = vpop.f32.mrf.mxu1 }
  0xa5   :  { %v133_v63 = vadd.f32 %v132_v61, %v40_v59  ;;  %v145_v0 = vadd.f32 %v144_v62, %v44_v60 }
  0xa7   :  { %178 = vst.msk [vmem:[%s459_s3 + $0x18] sm:$0xff] %vm174_vm1, %v133_v63 }
  0xa8   :  { %v156_v3 = vpop.f32.mrf.mxu2  ;;  %182 = vst.msk [vmem:[%s459_s3 + $0x38] sm:$0xff] %vm174_vm1, %v145_v0  ;;  %v171_v4 = vpop.f32.mrf.mxu3 }
  0xa9   :  { %v157_v5 = vadd.f32 %v156_v3, %v48_v1  ;;  %v172_v6 = vadd.f32 %v171_v4, %v53_v2 }
  0xab   :  { %186 = vst.msk [vmem:[%s459_s3 + $0x58] sm:$0xff] %vm174_vm1, %v157_v5 }
  0xac   :  { %191 = vst.msk [vmem:[%s459_s3 + $0x80] sm:$0xff] %vm174_vm1, %v172_v6 }
  0xb0   :  { %v159_v8 = vpop.f32.mrf.mxu2 }
  0xb1   :  { %v160_v9 = vadd.f32 %v159_v8, %v49_v7 }
  0xb3   :  { %187 = vst.msk [vmem:[%s459_s3 + $0x60] sm:$0xff] %vm174_vm1, %v160_v9 }

// kernel: tpu_custom_call.1
= control target key start
LH: loop header
LB: loop body
LE: loop exit
PB: predicated region body
PF: predicated region fallthrough
CT: control target
= control target key end

     0   :  { %vm54_vm0 = vcmask 392192   ;;  %vm174_vm1 = vcmask 261120   ;;  %s456_s1 = inlined_call_operand.vmem [shape: f32[48,32], index: 1, kind: input, shape index: {}]   ;;  %s457_s0 = inlined_call_operand.vmem [shape: f32[136,48], index: 0, kind: input, shape index: {}]   ;;  %s458_s2 = inlined_call_operand.vmem [shape: f32[136,32], index: 2, kind: input, shape index: {}]   ;;  %s459_s3 = inlined_call_operand.vmem [shape: f32[136,32], index: 3, kind: output, shape index: {}]  }
   0x1   :  { %v36_v0 = vld [vmem:[%s456_s1 + $0x28] sm:$0xff]  ;;  %v35_v1 = vld [vmem:[%s456_s1 + $0x20] sm:$0xff]  ;;  %v34_v2 = vld [vmem:[%s456_s1 + $0x18] sm:$0xff] }
   0x2   :  { %214 = vmatpush.msra.mxu2 %v36_v0  ;;  %215 = vmatpush.msra.mxu3 %v36_v0  ;;  %v33_v3 = vld [vmem:[%s456_s1 + $0x10] sm:$0xff]  ;;  %v32_v4 = vld [vmem:[%s456_s1 + $0x8] sm:$0xff]  ;;  %v31_v5 = vld [vmem:[%s456_s1] sm:$0xff] }
   0x3   :  { %116 = vmatpush.msra.mxu0 %v36_v0  ;;  %213 = vmatpush.msra.mxu1 %v36_v0  ;;  %v22_v6 = vld [vmem:[%s457_s0 + $0x40] sm:$0xff]  ;;  %v27_v7 = vld [vmem:[%s457_s0 + $0x68] sm:$0xff]  ;;  %v28_v11 = vld [vmem:[%s457_s0 + $0x70] sm:$0xff] }
   0x4   :  { %217 = vmatpush.msra.mxu2 %v35_v1  ;;  %218 = vmatpush.msra.mxu3 %v35_v1  ;;  %v14_v8 = vld [vmem:[%s457_s0] sm:$0xff]  ;;  %v23_v10 = vld [vmem:[%s457_s0 + $0x48] sm:$0xff]  ;;  %v24_v14 = vld [vmem:[%s457_s0 + $0x50] sm:$0xff] }
   0x5   :  { %117 = vmatpush.msra.mxu0 %v35_v1  ;;  %216 = vmatpush.msra.mxu1 %v35_v1  ;;  %v18_v9 = vld [vmem:[%s457_s0 + $0x20] sm:$0xff]  ;;  %v15_v12 = vld [vmem:[%s457_s0 + $0x8] sm:$0xff]  ;;  %v29_v15 = vld [vmem:[%s457_s0 + $0x78] sm:$0xff] }
   0x6   :  { %220 = vmatpush.msra.mxu2 %v34_v2  ;;  %221 = vmatpush.msra.mxu3 %v34_v2  ;;  %v19_v13 = vld [vmem:[%s457_s0 + $0x28] sm:$0xff]  ;;  %v16_v16 = vld [vmem:[%s457_s0 + $0x10] sm:$0xff]  ;;  %v25_v18 = vld [vmem:[%s457_s0 + $0x58] sm:$0xff] }
   0x7   :  { %118 = vmatpush.msra.mxu0 %v34_v2  ;;  %219 = vmatpush.msra.mxu1 %v34_v2  ;;  %v20_v17 = vld [vmem:[%s457_s0 + $0x30] sm:$0xff]  ;;  %v30_v19 = vld [vmem:[%s457_s0 + $0x80] sm:$0xff]  ;;  %v17_v20 = vld [vmem:[%s457_s0 + $0x18] sm:$0xff] }
   0x8   :  { %223 = vmatpush.msra.mxu2 %v33_v3  ;;  %224 = vmatpush.msra.mxu3 %v33_v3  ;;  %v21_v21 = vld [vmem:[%s457_s0 + $0x38] sm:$0xff]  ;;  %v26_v22 = vld [vmem:[%s457_s0 + $0x60] sm:$0xff]  ;;  %v50_v30 = vld [vmem:[%s458_s2 + $0x68] sm:$0xff] }
   0x9   :  { %119 = vmatpush.msra.mxu0 %v33_v3  ;;  %222 = vmatpush.msra.mxu1 %v33_v3  ;;  %v37_v23 = vld [vmem:[%s458_s2] sm:$0xff]  ;;  %v38_v35 = vld [vmem:[%s458_s2 + $0x8] sm:$0xff]  ;;  %v51_v42 = vld [vmem:[%s458_s2 + $0x70] sm:$0xff] }
   0xa   :  { %226 = vmatpush.msra.mxu2 %v32_v4  ;;  %227 = vmatpush.msra.mxu3 %v32_v4  ;;  %v41_v24 = vld [vmem:[%s458_s2 + $0x20] sm:$0xff]  ;;  %v42_v36 = vld [vmem:[%s458_s2 + $0x28] sm:$0xff]  ;;  %v39_v47 = vld [vmem:[%s458_s2 + $0x10] sm:$0xff] }
   0xb   :  { %120 = vmatpush.msra.mxu0 %v32_v4  ;;  %225 = vmatpush.msra.mxu1 %v32_v4  ;;  %v45_v29 = vld [vmem:[%s458_s2 + $0x40] sm:$0xff]  ;;  %v46_v41 = vld [vmem:[%s458_s2 + $0x48] sm:$0xff]  ;;  %v43_v48 = vld [vmem:[%s458_s2 + $0x30] sm:$0xff] }
   0xc   :  { %229 = vmatpush.msra.mxu2 %v31_v5  ;;  %230 = vmatpush.msra.mxu3 %v31_v5  ;;  %v47_v53 = vld [vmem:[%s458_s2 + $0x50] sm:$0xff]  ;;  %v52_v54 = vld [vmem:[%s458_s2 + $0x78] sm:$0xff]  ;;  %v53_v2 = vld [vmem:[%s458_s2 + $0x80] sm:$0xff] }
   0xd   :  { %204 = vmatmul.msk.f32.vlgmr.msra.gmra.mxu2 %vm54_vm0, %v22_v6  ;;  %209 = vmatmul.msk.f32.vlgmr.msra.gmra.mxu3 %vm54_vm0, %v27_v7  ;;  %v40_v59 = vld [vmem:[%s458_s2 + $0x18] sm:$0xff]  ;;  %v49_v7 = vld [vmem:[%s458_s2 + $0x60] sm:$0xff] }
   0xe   :  { %121 = vmatpush.msra.mxu0 %v31_v5  ;;  %228 = vmatpush.msra.mxu1 %v31_v5  ;;  %v44_v60 = vld [vmem:[%s458_s2 + $0x38] sm:$0xff] }
   0xf   :  { %196 = vmatmul.msk.f32.vlgmr.msra.gmra.mxu0 %vm54_vm0, %v14_v8  ;;  %200 = vmatmul.msk.f32.vlgmr.msra.gmra.mxu1 %vm54_vm0, %v18_v9  ;;  %v48_v1 = vld [vmem:[%s458_s2 + $0x58] sm:$0xff] }
  0x15   :  { %205 = vmatmul.msk.f32.gmra.mxu2 %vm54_vm0, %v23_v10  ;;  %210 = vmatmul.msk.f32.gmra.mxu3 %vm54_vm0, %v28_v11 }
  0x17   :  { %197 = vmatmul.msk.f32.gmra.mxu0 %vm54_vm0, %v15_v12  ;;  %201 = vmatmul.msk.f32.gmra.mxu1 %vm54_vm0, %v19_v13 }
  0x1d   :  { %206 = vmatmul.msk.f32.gmra.mxu2 %vm54_vm0, %v24_v14  ;;  %211 = vmatmul.msk.f32.gmra.mxu3 %vm54_vm0, %v29_v15 }
  0x1f   :  { %198 = vmatmul.msk.f32.gmra.mxu0 %vm54_vm0, %v16_v16  ;;  %202 = vmatmul.msk.f32.gmra.mxu1 %vm54_vm0, %v20_v17 }
  0x25   :  { %207 = vmatmul.msk.f32.gmra.mxu2 %vm54_vm0, %v25_v18  ;;  %212 = vmatmul.msk.f32.gmra.mxu3 %vm54_vm0, %v30_v19 }
  0x27   :  { %199 = vmatmul.msk.f32.gmra.mxu0 %vm54_vm0, %v17_v20  ;;  %203 = vmatmul.msk.f32.gmra.mxu1 %vm54_vm0, %v21_v21 }
  0x2d   :  { %208 = vmatmul.msk.f32.gmra.mxu2 %vm54_vm0, %v26_v22 }
  0x8c   :  { %v123_v25 = vpop.f32.mrf.mxu0  ;;  %v135_v26 = vpop.f32.mrf.mxu1 }
  0x8d   :  { %v124_v27 = vadd.f32 %v123_v25, %v37_v23  ;;  %v136_v28 = vadd.f32 %v135_v26, %v41_v24 }
  0x8f   :  { %175 = vst.msk [vmem:[%s459_s3] sm:$0xff] %vm174_vm1, %v124_v27 }
  0x90   :  { %v147_v31 = vpop.f32.mrf.mxu2  ;;  %179 = vst.msk [vmem:[%s459_s3 + $0x20] sm:$0xff] %vm174_vm1, %v136_v28  ;;  %v162_v32 = vpop.f32.mrf.mxu3 }
  0x91   :  { %v148_v33 = vadd.f32 %v147_v31, %v45_v29  ;;  %v163_v34 = vadd.f32 %v162_v32, %v50_v30 }
  0x93   :  { %183 = vst.msk [vmem:[%s459_s3 + $0x40] sm:$0xff] %vm174_vm1, %v148_v33 }
  0x94   :  { %188 = vst.msk [vmem:[%s459_s3 + $0x68] sm:$0xff] %vm174_vm1, %v163_v34  ;;  %v126_v37 = vpop.f32.mrf.mxu0  ;;  %v138_v38 = vpop.f32.mrf.mxu1 }
  0x95   :  { %v127_v39 = vadd.f32 %v126_v37, %v38_v35  ;;  %v139_v40 = vadd.f32 %v138_v38, %v42_v36 }
  0x97   :  { %176 = vst.msk [vmem:[%s459_s3 + $0x8] sm:$0xff] %vm174_vm1, %v127_v39 }
  0x98   :  { %v150_v43 = vpop.f32.mrf.mxu2  ;;  %180 = vst.msk [vmem:[%s459_s3 + $0x28] sm:$0xff] %vm174_vm1, %v139_v40  ;;  %v165_v44 = vpop.f32.mrf.mxu3 }
  0x99   :  { %v151_v45 = vadd.f32 %v150_v43, %v46_v41  ;;  %v166_v46 = vadd.f32 %v165_v44, %v51_v42 }
  0x9b   :  { %184 = vst.msk [vmem:[%s459_s3 + $0x48] sm:$0xff] %vm174_vm1, %v151_v45 }
  0x9c   :  { %189 = vst.msk [vmem:[%s459_s3 + $0x70] sm:$0xff] %vm174_vm1, %v166_v46  ;;  %v129_v49 = vpop.f32.mrf.mxu0  ;;  %v141_v50 = vpop.f32.mrf.mxu1 }
  0x9d   :  { %v130_v51 = vadd.f32 %v129_v49, %v39_v47  ;;  %v142_v52 = vadd.f32 %v141_v50, %v43_v48 }
  0x9f   :  { %177 = vst.msk [vmem:[%s459_s3 + $0x10] sm:$0xff] %vm174_vm1, %v130_v51 }
  0xa0   :  { %v153_v55 = vpop.f32.mrf.mxu2  ;;  %181 = vst.msk [vmem:[%s459_s3 + $0x30] sm:$0xff] %vm174_vm1, %v142_v52  ;;  %v168_v56 = vpop.f32.mrf.mxu3 }
  0xa1   :  { %v154_v57 = vadd.f32 %v153_v55, %v47_v53  ;;  %v169_v58 = vadd.f32 %v168_v56, %v52_v54 }
  0xa3   :  { %185 = vst.msk [vmem:[%s459_s3 + $0x50] sm:$0xff] %vm174_vm1, %v154_v57 }
  0xa4   :  { %190 = vst.msk [vmem:[%s459_s3 + $0x78] sm:$0xff] %vm174_vm1, %v169_v58  ;;  %v132_v61 = vpop.f32.mrf.mxu0  ;;  %v144_v62 = vpop.f32.mrf.mxu1 }
  0xa5   :  { %v133_v63 = vadd.f32 %v132_v61, %v40_v59  ;;  %v145_v0 = vadd.f32 %v144_v62, %v44_v60 }
  0xa7   :  { %178 = vst.msk [vmem:[%s459_s3 + $0x18] sm:$0xff] %vm174_vm1, %v133_v63 }
  0xa8   :  { %v156_v3 = vpop.f32.mrf.mxu2  ;;  %182 = vst.msk [vmem:[%s459_s3 + $0x38] sm:$0xff] %vm174_vm1, %v145_v0  ;;  %v171_v4 = vpop.f32.mrf.mxu3 }
  0xa9   :  { %v157_v5 = vadd.f32 %v156_v3, %v48_v1  ;;  %v172_v6 = vadd.f32 %v171_v4, %v53_v2 }
  0xab   :  { %186 = vst.msk [vmem:[%s459_s3 + $0x58] sm:$0xff] %vm174_vm1, %v157_v5 }
  0xac   :  { %191 = vst.msk [vmem:[%s459_s3 + $0x80] sm:$0xff] %vm174_vm1, %v172_v6 }
  0xb0   :  { %v159_v8 = vpop.f32.mrf.mxu2 }
  0xb1   :  { %v160_v9 = vadd.f32 %v159_v8, %v49_v7 }
  0xb3   :  { %187 = vst.msk [vmem:[%s459_s3 + $0x60] sm:$0xff] %vm174_vm1, %v160_v9 }

</bundles_post_ra>
